<compile_context>
chip_gen: v6e
topology: v6e:2x2x1
jax: 0.10.0
libtpu: 0.0.40
codegen_flags: <defaults>
</compile_context>

<pallas_src>
import jax
import jax.numpy as jnp
from jax.experimental import pallas as pl
from jax.experimental.pallas import tpu as pltpu


def _round_up(x: int, m: int) -> int:
    return ((x + m - 1) // m) * m


# ----------------------------- Pallas kernel --------------------------------
def _fe_value_kernel(bc_ref, uhT_ref, o_ref):
    # bc_ref : (TQ, L)   barycentric coords (== P1 basis values)
    # uhT_ref: (L, TC)   per-cell dof coefficients, transposed
    # o_ref  : (TQ, TC)  FE function values
    #
    # L is tiny (3 for triangles): unrolled VPU broadcast-FMA.  Each term is a
    # (TQ,1) x (1,TC) outer-product accumulate that stays on the VALU slots
    # and hides under the lane-dense output store (the true roofline here).
    L = bc_ref.shape[1]
    acc = bc_ref[:, 0:1] * uhT_ref[0:1, :]
    for i in range(1, L):
        acc = acc + bc_ref[:, i:i + 1] * uhT_ref[i:i + 1, :]
    o_ref[...] = acc


def lagrange_fe_value(bc: jnp.ndarray, uhT: jnp.ndarray,
                      *, tq: int = 256, tc: int = 2048) -> jnp.ndarray:
    """value[q, c] = sum_i bc[q, i] * uhT[i, c]  (P1 Lagrange evaluation).

    bc : (NQ, L) float32, uhT : (L, NC) float32.  Returns (NQ, NC) float32.
    Handles arbitrary NQ/NC by clamping the tile sizes and zero-padding.
    """
    NQ, L = bc.shape
    L2, NC = uhT.shape
    assert L == L2

    # Clamp tiles to the (aligned) problem size so small meshes don't get
    # blown up to the full default tile, then pad up to a tile multiple.
    tq_eff = min(tq, _round_up(NQ, 8))
    tc_eff = min(tc, _round_up(NC, 128))
    NQ_pad = _round_up(NQ, tq_eff)
    NC_pad = _round_up(NC, tc_eff)

    if NQ_pad != NQ:
        bc = jnp.pad(bc, ((0, NQ_pad - NQ), (0, 0)))
    if NC_pad != NC:
        uhT = jnp.pad(uhT, ((0, 0), (0, NC_pad - NC)))

    grid = (NQ_pad // tq_eff, NC_pad // tc_eff)
    out = pl.pallas_call(
        _fe_value_kernel,
        out_shape=jax.ShapeDtypeStruct((NQ_pad, NC_pad), jnp.float32),
        grid=grid,
        in_specs=[
            # last dim == full array dim (L), second-last divisible by 8
            pl.BlockSpec((tq_eff, L), lambda i, j: (i, 0)),
            # second-last dim == full array dim (L), last divisible by 128
            pl.BlockSpec((L, tc_eff), lambda i, j: (0, j)),
        ],
        out_specs=pl.BlockSpec((tq_eff, tc_eff), lambda i, j: (i, j)),
        compiler_params=pltpu.CompilerParams(
            dimension_semantics=("parallel", "parallel")
        ),
    )(bc, uhT)

    if NQ_pad != NQ or NC_pad != NC:
        out = out[:NQ, :NC]
    return out


# ------------------------------ module wrapper -------------------------------
class LagrangeFESpacePallas:
    """JAX/Pallas port of fealpy.pinn LagrangeFESapce (P1 simplex elements)."""

    def __init__(self, uh: jnp.ndarray, cell2dof: jnp.ndarray):
        # uh: (N_dof,) dof values; cell2dof: (NC, L) int indices.
        # Gather + transpose + cast hoisted here so forward pays nothing extra.
        self._uhT = jnp.transpose(
            uh.astype(jnp.float32)[cell2dof]
        )  # (L, NC), float32 -- one-time glue, plain JAX

    def __call__(self, bc: jnp.ndarray) -> jnp.ndarray:
        return lagrange_fe_value(bc.astype(jnp.float32), self._uhT)


# ---------------------------------- main -------------------------------------
if __name__ == "__main__":
    key = jax.random.PRNGKey(0)
    k_uh, k_cell, k_bc = jax.random.split(key, 3)

    NQ = 100        # number of quadrature / evaluation points (non-multiple of 8)
    NC = 250        # number of mesh cells (non-multiple of 128)
    L = 3           # barycentric components (triangles, TD+1)
    N_DOF = 200     # number of mesh nodes / dofs

    # Deterministic synthetic FE data (self-contained; no file reads).
    uh = jax.random.normal(k_uh, (N_DOF,), dtype=jnp.float32)
    cell2dof = jax.random.randint(k_cell, (NC, L), 0, N_DOF, dtype=jnp.int32)

    # Barycentric coordinates: positive and rows summing to 1.
    raw = jax.random.uniform(k_bc, (NQ, L), dtype=jnp.float32, minval=0.1, maxval=1.0)
    bc = raw / jnp.sum(raw, axis=-1, keepdims=True)

    space = LagrangeFESpacePallas(uh, cell2dof)
    val = space(bc)
    jax.block_until_ready(val)

    # Cross-check against a plain-JAX reference of the same semantics.
    ref = jnp.einsum("ql,cl->qc", bc, uh[cell2dof])
    assert val.shape == (NQ, NC)
    assert jnp.max(jnp.abs(val - ref)) < 1e-4

    print("KERNEL_OK")
</pallas_src>

<mosaic_0001>
module attributes {stable_mosaic.version = 11 : i64} {
  func.func @_fe_value_kernel(%arg0: i32, %arg1: i32, %arg2: memref<104x3xf32, #tpu.memory_space<vmem>>, %arg3: memref<3x256xf32, #tpu.memory_space<vmem>>, %arg4: memref<104x256xf32, #tpu.memory_space<vmem>>) attributes {dimension_semantics = [#tpu.dimension_semantics<parallel>, #tpu.dimension_semantics<parallel>], iteration_bounds = array<i64: 1, 1>, scalar_prefetch = 0 : i64, scratch_operands = 0 : i64, tpu.core_type = #tpu.core_type<tc>, window_params = [{transform_indices = @transform_0, window_bounds = array<i64: 104, 3>}, {transform_indices = @transform_1, window_bounds = array<i64: 3, 256>}, {transform_indices = @transform_2, window_bounds = array<i64: 104, 256>}]} {
    %c0 = arith.constant 0 : index
    %c0_0 = arith.constant 0 : index
    %0 = vector.load %arg2[%c0, %c0_0] : memref<104x3xf32, #tpu.memory_space<vmem>>, vector<104x1xf32>
    %c0_1 = arith.constant 0 : index
    %c0_2 = arith.constant 0 : index
    %1 = vector.load %arg3[%c0_1, %c0_2] : memref<3x256xf32, #tpu.memory_space<vmem>>, vector<1x256xf32>
    %2 = vector.broadcast %0 : vector<104x1xf32> to vector<104x256xf32>
    %3 = vector.broadcast %1 : vector<1x256xf32> to vector<104x256xf32>
    %4 = arith.mulf %2, %3 : vector<104x256xf32>
    %c0_3 = arith.constant 0 : index
    %c1 = arith.constant 1 : index
    %5 = vector.load %arg2[%c0_3, %c1] : memref<104x3xf32, #tpu.memory_space<vmem>>, vector<104x1xf32>
    %c1_4 = arith.constant 1 : index
    %c0_5 = arith.constant 0 : index
    %6 = vector.load %arg3[%c1_4, %c0_5] : memref<3x256xf32, #tpu.memory_space<vmem>>, vector<1x256xf32>
    %7 = vector.broadcast %5 : vector<104x1xf32> to vector<104x256xf32>
    %8 = vector.broadcast %6 : vector<1x256xf32> to vector<104x256xf32>
    %9 = arith.mulf %7, %8 : vector<104x256xf32>
    %10 = arith.addf %4, %9 : vector<104x256xf32>
    %c0_6 = arith.constant 0 : index
    %c2 = arith.constant 2 : index
    %11 = vector.load %arg2[%c0_6, %c2] : memref<104x3xf32, #tpu.memory_space<vmem>>, vector<104x1xf32>
    %c2_7 = arith.constant 2 : index
    %c0_8 = arith.constant 0 : index
    %12 = vector.load %arg3[%c2_7, %c0_8] : memref<3x256xf32, #tpu.memory_space<vmem>>, vector<1x256xf32>
    %13 = vector.broadcast %11 : vector<104x1xf32> to vector<104x256xf32>
    %14 = vector.broadcast %12 : vector<1x256xf32> to vector<104x256xf32>
    %15 = arith.mulf %13, %14 : vector<104x256xf32>
    %16 = arith.addf %10, %15 : vector<104x256xf32>
    %c0_9 = arith.constant 0 : index
    %c0_10 = arith.constant 0 : index
    %17 = vector.load %arg4[%c0_9, %c0_10] : memref<104x256xf32, #tpu.memory_space<vmem>>, vector<104x256xf32>
    tpu.vector_store %arg4[%c0_9, %c0_10], %16 {strides = array<i32>} : memref<104x256xf32, #tpu.memory_space<vmem>>, vector<104x256xf32>,
    return
  }
  func.func @transform_0(%arg0: i32, %arg1: i32) -> (i32, i32) {
    %c0_i32 = arith.constant 0 : i32
    %c0_i32_0 = arith.constant 0 : i32
    return %arg0, %c0_i32 : i32, i32
  }
  func.func @transform_1(%arg0: i32, %arg1: i32) -> (i32, i32) {
    %c0_i32 = arith.constant 0 : i32
    %c0_i32_0 = arith.constant 0 : i32
    return %c0_i32, %arg1 : i32, i32
  }
  func.func @transform_2(%arg0: i32, %arg1: i32) -> (i32, i32) {
    %c0_i32 = arith.constant 0 : i32
    return %arg0, %arg1 : i32, i32
  }
}

</mosaic_0001>

<bundles_post_ra>
// kernel: tpu_custom_call.1
= control target key start
LH: loop header
LB: loop body
LE: loop exit
PB: predicated region body
PF: predicated region fallthrough
CT: control target
= control target key end

     0   :  { %v440_v2 = vmov 0   ;;  %s676_s0 = inlined_call_operand.vmem [shape: f32[104,3], index: 0, kind: input, shape index: {}]   ;;  %s677_s1 = inlined_call_operand.vmem [shape: f32[3,256], index: 1, kind: input, shape index: {}]   ;;  %s678_s2 = inlined_call_operand.hbm [shape: f32[104,256], index: 2, kind: output, shape index: {}]  }
   0x1   :  { %v14_v0 = vld [vmem:[%s676_s0 + $0x10] sm:$0xff]  ;;  %v12_v1 = vld [vmem:[%s676_s0] sm:$0xff]  ;;  %413 = vset.pattern.permute.xlu1 %v440_v2  ;;  %412 = vset.pattern.permute.xlu0 %v440_v2  ;;  %v15_v3 = vld [vmem:[%s676_s0 + $0x18] sm:$0xff] }
   0x2   :  { %38 = vperm.xlu1 %413, %v14_v0   ;;  %28 = vperm.xlu0 %412, %v12_v1   ;;  %v13_v4 = vld [vmem:[%s676_s0 + $0x8] sm:$0xff] }
   0x3   :  { %7 = vsyncpa [#allocation3], 0  ;;  %v17_v5 = vld [vmem:[%s676_s0 + $0x28] sm:$0xff]  ;;  %v16_v6 = vld [vmem:[%s676_s0 + $0x20] sm:$0xff]  ;;  %v441_v14 = vmov 1   ;;  %v442_v15 = vmov 2   ;;  %v92_v32 = vlaneseq }
   0x4   :  { %v19_v7 = vld [vmem:[%s676_s0 + $0x38] sm:$0xff]  ;;  %v18_v8 = vld [vmem:[%s676_s0 + $0x30] sm:$0xff]  ;;  %v21_v9 = vld [vmem:[%s676_s0 + $0x48] sm:$0xff] }
   0x5   :  { %v20_v10 = vld [vmem:[%s676_s0 + $0x40] sm:$0xff]  ;;  %v23_v11 = vld [vmem:[%s676_s0 + $0x58] sm:$0xff]  ;;  %v22_v12 = vld [vmem:[%s676_s0 + $0x50] sm:$0xff]  ;;  %v93_v35 = vshrl.u32 %v92_v32, 7 }
   0x6   :  { %43 = vperm.xlu1 %413, %v15_v3   ;;  %33 = vperm.xlu0 %412, %v13_v4   ;;  %v24_v13 = vld [vmem:[%s676_s0 + $0x60] sm:$0xff] }
   0x7   :  { %v94_v38 = vsub.s32 0, %v93_v35  ;;  %v98_v39 = vsub.s32 1, %v93_v35  ;;  %v25_v40 = vld [vmem:[%s677_s1] ss:$4 sm:$0x3] }
   0x8   :  { %v404_v45 = vld [vmem:[%s677_s1 + $0x1] ss:$4 sm:$0x3]  ;;  %v405_v46 = vld [vmem:[%s677_s1 + $0x2] ss:$4 sm:$0x3] }
   0x9   :  { %v517_v43 = vrot.slane %v25_v40, %v94_v38  ;;  %v519_v44 = vrot.slane %v25_v40, %v98_v39  ;;  %v527_v47 = vrot.slane %v404_v45, %v94_v38  ;;  %v529_v48 = vrot.slane %v404_v45, %v98_v39  ;;  %s443_s1 = smov [#allocation2]  }
   0xa   :  { %53 = vperm.xlu1 %413, %v17_v5   ;;  %48 = vperm.xlu0 %412, %v16_v6   ;;  %v537_v53 = vrot.slane %v405_v46, %v94_v38  ;;  %v539_v54 = vrot.slane %v405_v46, %v98_v39  ;;  %s393_s12 = sshll.u32 %s443_s1, 4  ;;  %s394_s12 = int_to_ptr.vmem [resolvable:$true] %s393_s12 }
   0xb   :  { %s418_s13 = scalar_lea.vmem %s394_s12, 3328  ;;  %p423_p1 = scmp.lt.s32.totalorder %s394_s12, %s394_s12 }
   0xc   :  { %p419_p0 = scmp.ne.s32.totalorder %s394_s12, %s418_s13  ;;  %p424_p2 = scmp.lt.s32.totalorder %s418_s13, %s418_s13 }
   0xe   :  { %63 = vperm.xlu1 %413, %v19_v7   ;;  %58 = vperm.xlu0 %412, %v18_v8   ;;  %p425_p3 = por %p424_p2, %p423_p1 }
  0x10   :  { %p426_p4 = pnand %p425_p3, %p419_p0 }
  0x12   :  { %73 = vperm.xlu1 %413, %v21_v9   ;;  %68 = vperm.xlu0 %412, %v20_v10  }
  0x16   :  { %83 = vperm.xlu1 %413, %v23_v11   ;;  %78 = vperm.xlu0 %412, %v22_v12  }
  0x1a   :  { %414 = vset.pattern.permute.xlu1 %v441_v14  ;;  %88 = vperm.xlu0 %412, %v24_v13  }
  0x1b   :  { %131 = vperm.xlu1 %414, %v12_v1  }
  0x1e   :  { %415 = vset.pattern.permute.xlu0 %v441_v14 }
  0x1f   :  { %139 = vperm.xlu1 %414, %v14_v0   ;;  %135 = vperm.xlu0 %415, %v13_v4  }
  0x23   :  { %143 = vperm.xlu1 %414, %v15_v3   ;;  %147 = vperm.xlu0 %415, %v16_v6  }
  0x27   :  { %151 = vperm.xlu1 %414, %v17_v5   ;;  %155 = vperm.xlu0 %415, %v18_v8  }
  0x2b   :  { %159 = vperm.xlu1 %414, %v19_v7   ;;  %163 = vperm.xlu0 %415, %v20_v10  }
  0x2f   :  { %167 = vperm.xlu1 %414, %v21_v9   ;;  %171 = vperm.xlu0 %415, %v22_v12  }
  0x33   :  { %175 = vperm.xlu1 %414, %v23_v11   ;;  %179 = vperm.xlu0 %415, %v24_v13  }
  0x37   :  { %416 = vset.pattern.permute.xlu1 %v442_v15  ;;  %417 = vset.pattern.permute.xlu0 %v442_v15 }
  0x38   :  { %248 = vperm.xlu1 %416, %v12_v1   ;;  %252 = vperm.xlu0 %417, %v13_v4  }
  0x3c   :  { %256 = vperm.xlu1 %416, %v14_v0   ;;  %264 = vperm.xlu0 %417, %v16_v6  }
  0x40   :  { %260 = vperm.xlu1 %416, %v15_v3   ;;  %272 = vperm.xlu0 %417, %v18_v8  }
  0x44   :  { %268 = vperm.xlu1 %416, %v17_v5   ;;  %280 = vperm.xlu0 %417, %v20_v10  }
  0x48   :  { %276 = vperm.xlu1 %416, %v19_v7   ;;  %288 = vperm.xlu0 %417, %v22_v12  }
  0x4c   :  { %284 = vperm.xlu1 %416, %v21_v9   ;;  %296 = vperm.xlu0 %417, %v24_v13  }
  0x50   :  { %292 = vperm.xlu1 %416, %v23_v11  }
  0x7d   :  { %v39_v16 = vpop.permute.xlu1 %38  ;;  %v29_v17 = vpop.permute.xlu0 %28 }
  0x7e   :  { %v106_v51 = vmul.f32 %v517_v43, %v39_v16  ;;  %v107_v52 = vmul.f32 %v519_v44, %v39_v16  ;;  %v102_v55 = vmul.f32 %v517_v43, %v29_v17  ;;  %v103_v56 = vmul.f32 %v519_v44, %v29_v17 }
  0x81   :  { %v44_v18 = vpop.permute.xlu1 %43  ;;  %v34_v19 = vpop.permute.xlu0 %33 }
  0x82   :  { %v108_v57 = vmul.f32 %v517_v43, %v44_v18  ;;  %v109_v58 = vmul.f32 %v519_v44, %v44_v18  ;;  %v104_v59 = vmul.f32 %v517_v43, %v34_v19  ;;  %v105_v60 = vmul.f32 %v519_v44, %v34_v19 }
  0x85   :  { %v54_v20 = vpop.permute.xlu1 %53  ;;  %v49_v21 = vpop.permute.xlu0 %48 }
  0x86   :  { %v548_v61 = vmul.f32 %v517_v43, %v54_v20  ;;  %v551_v62 = vmul.f32 %v519_v44, %v54_v20  ;;  %v110_v63 = vmul.f32 %v517_v43, %v49_v21  ;;  %v111_v0 = vmul.f32 %v519_v44, %v49_v21 }
  0x89   :  { %v64_v22 = vpop.permute.xlu1 %63  ;;  %v59_v23 = vpop.permute.xlu0 %58 }
  0x8a   :  { %v562_v5 = vmul.f32 %v517_v43, %v64_v22  ;;  %v565_v6 = vmul.f32 %v519_v44, %v64_v22  ;;  %v114_v9 = vmul.f32 %v517_v43, %v59_v23  ;;  %v115_v10 = vmul.f32 %v519_v44, %v59_v23 }
  0x8d   :  { %v74_v24 = vpop.permute.xlu1 %73  ;;  %v69_v25 = vpop.permute.xlu0 %68 }
  0x8e   :  { %v572_v11 = vmul.f32 %v517_v43, %v74_v24  ;;  %v575_v12 = vmul.f32 %v519_v44, %v74_v24  ;;  %v578_v13 = vmul.f32 %v517_v43, %v69_v25  ;;  %v581_v14 = vmul.f32 %v519_v44, %v69_v25 }
  0x91   :  { %v500_v26 = vpop.permute.xlu1 %83  ;;  %v79_v27 = vpop.permute.xlu0 %78 }
  0x92   :  { %v586_v17 = vmul.f32 %v517_v43, %v79_v27  ;;  %v589_v18 = vmul.f32 %v519_v44, %v79_v27 }
  0x95   :  { %v502_v28 = vpop.permute.xlu0 %88 }
  0x96   :  { %v132_v29 = vpop.permute.xlu1 %131 }
  0x97   :  { %v193_v1 = vmul.f32 %v527_v47, %v132_v29  ;;  %v194_v2 = vmul.f32 %v529_v48, %v132_v29 }
  0x99   :  { %v219_v19 = vadd.f32 %v193_v1, %v102_v55  ;;  %v220_v20 = vadd.f32 %v194_v2, %v103_v56 }
  0x9a   :  { %v140_v30 = vpop.permute.xlu1 %139  ;;  %v136_v31 = vpop.permute.xlu0 %135 }
  0x9b   :  { %v195_v7 = vmul.f32 %v527_v47, %v136_v31  ;;  %v196_v8 = vmul.f32 %v529_v48, %v136_v31  ;;  %v197_v15 = vmul.f32 %v527_v47, %v140_v30  ;;  %v198_v16 = vmul.f32 %v529_v48, %v140_v30 }
  0x9d   :  { %v221_v21 = vadd.f32 %v195_v7, %v104_v59  ;;  %v222_v22 = vadd.f32 %v196_v8, %v105_v60  ;;  %v223_v27 = vadd.f32 %v197_v15, %v106_v51  ;;  %v224_v38 = vadd.f32 %v198_v16, %v107_v52 }
  0x9e   :  { %v504_v33 = vpop.permute.xlu1 %143  ;;  %v148_v34 = vpop.permute.xlu0 %147 }
  0x9f   :  { %v201_v23 = vmul.f32 %v527_v47, %v148_v34  ;;  %v202_v24 = vmul.f32 %v529_v48, %v148_v34  ;;  %v199_v39 = vmul.f32 %v527_v47, %v504_v33  ;;  %v200_v40 = vmul.f32 %v529_v48, %v504_v33 }
  0xa1   :  { %v227_v56 = vadd.f32 %v201_v23, %v110_v63  ;;  %v228_v59 = vadd.f32 %v202_v24, %v111_v0  ;;  %v225_v0 = vadd.f32 %v199_v39, %v108_v57  ;;  %v226_v8 = vadd.f32 %v200_v40, %v109_v58 }
  0xa2   :  { %v506_v36 = vpop.permute.xlu1 %151  ;;  %v508_v37 = vpop.permute.xlu0 %155 }
  0xa3   :  { %v205_v60 = vmul.f32 %v527_v47, %v508_v37  ;;  %v206_v1 = vmul.f32 %v529_v48, %v508_v37  ;;  %v203_v15 = vmul.f32 %v527_v47, %v506_v36  ;;  %v204_v37 = vmul.f32 %v529_v48, %v506_v36 }
  0xa5   :  { %v232_v23 = vadd.f32 %v206_v1, %v115_v10  ;;  %v229_v10 = vadd.f32 %v203_v15, %v548_v61  ;;  %v126_v15 = vmul.f32 %v517_v43, %v502_v28 }
  0xa6   :  { %v513_v41 = vpop.permute.xlu1 %159  ;;  %v515_v42 = vpop.permute.xlu0 %163 }
  0xa7   :  { %v209_v24 = vmul.f32 %v527_v47, %v515_v42 }
  0xa9   :  { %v235_v40 = vadd.f32 %v209_v24, %v578_v13 }
  0xaa   :  { %v531_v49 = vpop.permute.xlu1 %167  ;;  %v533_v50 = vpop.permute.xlu0 %171 }
  0xab   :  { %v214_v61 = vmul.f32 %v529_v48, %v533_v50 }
  0xae   :  { %v557_v3 = vpop.permute.xlu1 %175  ;;  %v559_v4 = vpop.permute.xlu0 %179 }
  0xaf   :  { %v216_v24 = vmul.f32 %v529_v48, %v557_v3 }
  0xb3   :  { %v249_v25 = vpop.permute.xlu1 %248  ;;  %v253_v29 = vpop.permute.xlu0 %252 }
  0xb4   :  { %v310_v31 = vmul.f32 %v537_v53, %v249_v25  ;;  %v311_v30 = vmul.f32 %v539_v54, %v249_v25  ;;  %v312_v32 = vmul.f32 %v537_v53, %v253_v29  ;;  %v313_v35 = vmul.f32 %v539_v54, %v253_v29 }
  0xb5   :  { %v210_v25 = vmul.f32 %v529_v48, %v515_v42  ;;  %v207_v42 = vmul.f32 %v527_v47, %v513_v41 }
  0xb6   :  { %v336_v45 = vadd.f32 %v310_v31, %v219_v19  ;;  %v337_v34 = vadd.f32 %v311_v30, %v220_v20  ;;  %v338_v46 = vadd.f32 %v312_v32, %v221_v21  ;;  %v339_v55 = vadd.f32 %v313_v35, %v222_v22 }
  0xb7   :  { %v257_v51 = vpop.permute.xlu1 %256  ;;  %v265_v52 = vpop.permute.xlu0 %264  ;;  %v231_v22 = vadd.f32 %v205_v60, %v114_v9  ;;  %v230_v30 = vadd.f32 %v204_v37, %v551_v62  ;;  %v208_v32 = vmul.f32 %v529_v48, %v513_v41  ;;  %v212_v60 = vmul.f32 %v529_v48, %v531_v49 }
  0xb8   :  { %362 = vst [vmem:[#allocation2] sm:$0xff] %v336_v45  ;;  %363 = vst [vmem:[#allocation2 + $0x8] sm:$0xff] %v337_v34  ;;  %v314_v33 = vmul.f32 %v537_v53, %v257_v51  ;;  %v315_v2 = vmul.f32 %v539_v54, %v257_v51  ;;  %v318_v7 = vmul.f32 %v537_v53, %v265_v52 }
  0xb9   :  { %364 = vst [vmem:[#allocation2 + $0x10] sm:$0xff] %v338_v46  ;;  %365 = vst [vmem:[#allocation2 + $0x18] sm:$0xff] %v339_v55  ;;  %v319_v63 = vmul.f32 %v539_v54, %v265_v52  ;;  %v236_v45 = vadd.f32 %v210_v25, %v581_v14  ;;  %v213_v34 = vmul.f32 %v527_v47, %v533_v50 }
  0xba   :  { %v340_v16 = vadd.f32 %v314_v33, %v223_v27  ;;  %v341_v19 = vadd.f32 %v315_v2, %v224_v38  ;;  %v344_v20 = vadd.f32 %v318_v7, %v227_v56  ;;  %v233_v56 = vadd.f32 %v207_v42, %v562_v5 }
  0xbb   :  { %v345_v21 = vadd.f32 %v319_v63, %v228_v59  ;;  %v261_v57 = vpop.permute.xlu1 %260  ;;  %v273_v58 = vpop.permute.xlu0 %272  ;;  %v234_v59 = vadd.f32 %v208_v32, %v565_v6  ;;  %v211_v50 = vmul.f32 %v527_v47, %v531_v49  ;;  %v239_v2 = vadd.f32 %v213_v34, %v586_v17 }
  0xbc   :  { %366 = vst [vmem:[#allocation2 + $0x20] sm:$0xff] %v340_v16  ;;  %367 = vst [vmem:[#allocation2 + $0x28] sm:$0xff] %v341_v19  ;;  %v316_v36 = vmul.f32 %v537_v53, %v261_v57  ;;  %v317_v29 = vmul.f32 %v539_v54, %v261_v57  ;;  %v322_v31 = vmul.f32 %v537_v53, %v273_v58 }
  0xbd   :  { %370 = vst [vmem:[#allocation2 + $0x40] sm:$0xff] %v344_v20  ;;  %371 = vst [vmem:[#allocation2 + $0x48] sm:$0xff] %v345_v21  ;;  %v323_v9 = vmul.f32 %v539_v54, %v273_v58  ;;  %v240_v7 = vadd.f32 %v214_v61, %v589_v18  ;;  %v217_v63 = vmul.f32 %v527_v47, %v559_v4 }
  0xbe   :  { %v342_v35 = vadd.f32 %v316_v36, %v225_v0  ;;  %v343_v27 = vadd.f32 %v317_v29, %v226_v8  ;;  %v348_v38 = vadd.f32 %v322_v31, %v231_v22  ;;  %v218_v5 = vmul.f32 %v529_v48, %v559_v4 }
  0xbf   :  { %v349_v39 = vadd.f32 %v323_v9, %v232_v23  ;;  %v269_v62 = vpop.permute.xlu1 %268  ;;  %v281_v46 = vpop.permute.xlu0 %280  ;;  %v127_v4 = vmul.f32 %v519_v44, %v502_v28  ;;  %v237_v37 = vadd.f32 %v211_v50, %v572_v11  ;;  %v238_v16 = vadd.f32 %v212_v60, %v575_v12 }
  0xc0   :  { %368 = vst [vmem:[#allocation2 + $0x30] sm:$0xff] %v342_v35  ;;  %369 = vst [vmem:[#allocation2 + $0x38] sm:$0xff] %v343_v27  ;;  %v320_v41 = vmul.f32 %v537_v53, %v269_v62  ;;  %v321_v55 = vmul.f32 %v539_v54, %v269_v62  ;;  %v326_v13 = vmul.f32 %v537_v53, %v281_v46 }
  0xc1   :  { %374 = vst [vmem:[#allocation2 + $0x60] sm:$0xff] %v348_v38  ;;  %375 = vst [vmem:[#allocation2 + $0x68] sm:$0xff] %v349_v39  ;;  %v327_v14 = vmul.f32 %v539_v54, %v281_v46  ;;  %v215_v23 = vmul.f32 %v527_v47, %v557_v3  ;;  %v243_v25 = vadd.f32 %v217_v63, %v126_v15 }
  0xc2   :  { %v346_v1 = vadd.f32 %v320_v41, %v229_v10  ;;  %v347_v51 = vadd.f32 %v321_v55, %v230_v30  ;;  %v352_v52 = vadd.f32 %v326_v13, %v235_v40  ;;  %v244_v57 = vadd.f32 %v218_v5, %v127_v4 }
  0xc3   :  { %v353_v33 = vadd.f32 %v327_v14, %v236_v45  ;;  %v277_v6 = vpop.permute.xlu1 %276  ;;  %v289_v0 = vpop.permute.xlu0 %288  ;;  %v124_v47 = vmul.f32 %v517_v43, %v500_v26  ;;  %v125_v48 = vmul.f32 %v519_v44, %v500_v26 }
  0xc4   :  { %372 = vst [vmem:[#allocation2 + $0x50] sm:$0xff] %v346_v1  ;;  %373 = vst [vmem:[#allocation2 + $0x58] sm:$0xff] %v347_v51  ;;  %v324_v49 = vmul.f32 %v537_v53, %v277_v6  ;;  %v325_v8 = vmul.f32 %v539_v54, %v277_v6  ;;  %v330_v17 = vmul.f32 %v537_v53, %v289_v0 }
  0xc5   :  { %378 = vst [vmem:[#allocation2 + $0x80] sm:$0xff] %v352_v52  ;;  %379 = vst [vmem:[#allocation2 + $0x88] sm:$0xff] %v353_v33  ;;  %v331_v18 = vmul.f32 %v539_v54, %v289_v0  ;;  %v241_v42 = vadd.f32 %v215_v23, %v124_v47  ;;  %v242_v32 = vadd.f32 %v216_v24, %v125_v48 }
  0xc6   :  { %v350_v19 = vadd.f32 %v324_v49, %v233_v56  ;;  %v351_v20 = vadd.f32 %v325_v8, %v234_v59  ;;  %v356_v21 = vadd.f32 %v330_v17, %v239_v2 }
  0xc7   :  { %v357_v22 = vadd.f32 %v331_v18, %v240_v7  ;;  %v285_v58 = vpop.permute.xlu1 %284  ;;  %v297_v36 = vpop.permute.xlu0 %296 }
  0xc8   :  { %376 = vst [vmem:[#allocation2 + $0x70] sm:$0xff] %v350_v19  ;;  %377 = vst [vmem:[#allocation2 + $0x78] sm:$0xff] %v351_v20  ;;  %v328_v28 = vmul.f32 %v537_v53, %v285_v58  ;;  %v329_v11 = vmul.f32 %v539_v54, %v285_v58  ;;  %v334_v12 = vmul.f32 %v537_v53, %v297_v36 }
  0xc9   :  { %382 = vst [vmem:[#allocation2 + $0xa0] sm:$0xff] %v356_v21  ;;  %383 = vst [vmem:[#allocation2 + $0xa8] sm:$0xff] %v357_v22  ;;  %v335_v29 = vmul.f32 %v539_v54, %v297_v36 }
  0xca   :  { %v354_v3 = vadd.f32 %v328_v28, %v237_v37  ;;  %v355_v31 = vadd.f32 %v329_v11, %v238_v16  ;;  %v360_v9 = vadd.f32 %v334_v12, %v243_v25 }
  0xcb   :  { %v361_v10 = vadd.f32 %v335_v29, %v244_v57  ;;  %v293_v30 = vpop.permute.xlu1 %292 }
  0xcc   :  { %380 = vst [vmem:[#allocation2 + $0x90] sm:$0xff] %v354_v3  ;;  %381 = vst [vmem:[#allocation2 + $0x98] sm:$0xff] %v355_v31  ;;  %v332_v35 = vmul.f32 %v537_v53, %v293_v30  ;;  %v333_v43 = vmul.f32 %v539_v54, %v293_v30 }
  0xcd   :  { %386 = vst [vmem:[#allocation2 + $0xc0] sm:$0xff] %v360_v9  ;;  %387 = vst [vmem:[#allocation2 + $0xc8] sm:$0xff] %v361_v10 }
  0xce   :  { %v358_v27 = vadd.f32 %v332_v35, %v241_v42  ;;  %v359_v26 = vadd.f32 %v333_v43, %v242_v32 }
  0xd0   :  { %384 = vst [vmem:[#allocation2 + $0xb0] sm:$0xff] %v358_v27  ;;  %385 = vst [vmem:[#allocation2 + $0xb8] sm:$0xff] %v359_v26 }
  0xd1   :  { %429 = shalt.err (!%p426_p4)
}
  0xd2   :  { %s444_s14 = smov 256   ;;  %s445_s15 = smov 16  }
  0xd3   :  { %399 = dma.vmem_to_hbm [thread:$0]  %s394_s12, 3328, %s678_s2, [#allocation3], %s444_s14, %s444_s14, %s445_s15  }
  0xd4   :  { %438 = dma.done.wait [#allocation3], 3328  }
  0xd5   :  { %439 = vsyncadd [#allocation3], 4294963968 }
  0xd6   :  { %403 = vsyncpa [#allocation3], 1 }

</bundles_post_ra>
